<compile_context>
chip_gen: v5e
topology: v5e:2x2
jax: 0.10.0
libtpu: 0.0.40
codegen_flags: <defaults>
</compile_context>

<pallas_src>
import functools

import jax
import jax.numpy as jnp
from jax import lax
from jax.experimental import pallas as pl
from jax.experimental.pallas import tpu as pltpu

_GUARD = 128  # zero-guard lanes on each side of the flat image (must be >= W + 1)


def _resblock_kernel(x_ref, w1_ref, b1_ref, w2_ref, b2_ref, out_ref,
                     *, bb, Cin, Cmid, H, W):
    # x_ref:   (bb, Cin, L)      f32  dense flattened images (row-major, L = H*W)
    # w1_ref:  (9, Cmid, Cin)    f32  conv3x3 weights, tap-major (t = ky*3 + kx)
    # b1_ref:  (Cmid, 1)         f32
    # w2_ref:  (Cin, Cmid)       f32  conv1x1 weights
    # b2_ref:  (Cin, 1)          f32
    # out_ref: (bb, Cin, L)      f32
    L = H * W
    G = _GUARD

    # Hoisted once per grid step: weights, biases, zero guard, column masks.
    w1_taps = [w1_ref[t] for t in range(9)]          # each (Cmid, Cin)
    w2 = w2_ref[...]                                 # (Cin, Cmid)
    b1 = b1_ref[...]                                 # (Cmid, 1)
    b2 = b2_ref[...]                                 # (Cin, 1)

    col = lax.broadcasted_iota(jnp.int32, (1, L), 1) % W
    ok_left = col >= 1          # source column (w - 1) is inside the image
    ok_right = col <= W - 2     # source column (w + 1) is inside the image
    zguard = jnp.zeros((Cin, G), jnp.float32)

    offsets = [(ky - 1, kx - 1) for ky in range(3) for kx in range(3)]

    for b in range(bb):         # static unroll; bb is kept small (<= 4)
        xb = x_ref[b]                                           # (Cin, L) f32, aligned
        g = jnp.concatenate([zguard, xb, zguard], axis=1)       # (Cin, L + 2G)

        # conv3x3 as 9 accumulating (Cmid, Cin) @ (Cin, L) dots on register taps.
        acc = None
        for t, (oy, ox) in enumerate(offsets):
            off = oy * W + ox
            tap = g[:, G + off:G + off + L]                     # (Cin, L)
            if ox == -1:
                tap = jnp.where(ok_left, tap, 0.0)
            elif ox == 1:
                tap = jnp.where(ok_right, tap, 0.0)
            d = jnp.dot(w1_taps[t], tap, preferred_element_type=jnp.float32)
            acc = d if acc is None else acc + d                 # (Cmid, L) f32

        mid = jnp.maximum(acc + b1, 0.0)                        # conv3x3 + bias + ReLU
        y = jnp.dot(w2, mid, preferred_element_type=jnp.float32) + b2   # conv1x1 + bias

        # Residual add (aligned dense image) + final ReLU; lane-dense (256) store.
        out_ref[b] = jnp.maximum(y + xb, 0.0).astype(out_ref.dtype)


def _pick_block_batch(B):
    # Keep >= 2 grid steps for DMA pipelining / megacore whenever possible; a couple
    # of images per step is plenty (per-step overhead ~0.35 us).
    if B <= 3:
        return 1
    for bb in (4, 2, 1):
        if B % bb == 0 and B // bb >= 2:
            return bb
    return 1


def resblock_forward(x, w1_oihw, b1, w2_oi, b2):
    """x: (B, Cin, H, W) f32.  Weights in PyTorch layouts:
       w1_oihw (Cmid, Cin, 3, 3), b1 (Cmid,), w2_oi (Cin, Cmid), b2 (Cin,)."""
    B, Cin, H, W = x.shape
    Cmid = w1_oihw.shape[0]
    L = H * W
    assert L % 128 == 0, "H*W must be a multiple of 128 for the lane-dense layout"
    assert W + 1 <= _GUARD, "guard region too small for this width"

    bb = _pick_block_batch(B)
    nb = B // bb
    assert bb * nb == B, "batch must be divisible by the per-step block"

    # ---- wrapper-side plumbing: reshapes only (no pad / slice HBM passes) ----
    x2 = x.reshape(B, Cin, L)
    # conv3x3 weights -> (9, Cmid, Cin), tap-major (ky, kx); indexed per tap in-kernel.
    w1m = jnp.transpose(w1_oihw, (2, 3, 0, 1)).reshape(9, Cmid, Cin).astype(jnp.float32)
    w2m = w2_oi.astype(jnp.float32)                      # (Cin, Cmid)
    b1c = b1.reshape(Cmid, 1).astype(jnp.float32)
    b2c = b2.reshape(Cin, 1).astype(jnp.float32)

    kernel = functools.partial(_resblock_kernel, bb=bb, Cin=Cin, Cmid=Cmid, H=H, W=W)

    flops = 2 * B * L * (9 * Cin * Cmid + Cmid * Cin)
    bytes_accessed = int(4 * (2 * B * Cin * L + w1m.size + w2m.size + b1c.size + b2c.size))

    out_flat = pl.pallas_call(
        kernel,
        out_shape=jax.ShapeDtypeStruct((B, Cin, L), jnp.float32),
        grid=(nb,),
        in_specs=[
            pl.BlockSpec((bb, Cin, L), lambda g: (g, 0, 0)),
            pl.BlockSpec((9, Cmid, Cin), lambda g: (0, 0, 0)),
            pl.BlockSpec((Cmid, 1), lambda g: (0, 0)),
            pl.BlockSpec((Cin, Cmid), lambda g: (0, 0)),
            pl.BlockSpec((Cin, 1), lambda g: (0, 0)),
        ],
        out_specs=pl.BlockSpec((bb, Cin, L), lambda g: (g, 0, 0)),
        compiler_params=pltpu.CompilerParams(
            dimension_semantics=("parallel",)),
        cost_estimate=pl.CostEstimate(
            flops=flops, transcendentals=0, bytes_accessed=bytes_accessed),
    )(x2, w1m, b1c, w2m, b2c)

    return out_flat.reshape(B, Cin, H, W)


def resblock_reference(x, w1_oihw, b1, w2_oi, b2):
    """Pure-JAX f32 reference mirroring the PyTorch module semantics."""
    y = lax.conv_general_dilated(
        x, w1_oihw, window_strides=(1, 1), padding=((1, 1), (1, 1)),
        dimension_numbers=('NCHW', 'OIHW', 'NCHW'))
    y = jnp.maximum(y + b1[None, :, None, None], 0.0)
    y = jnp.einsum('om,bmhw->bohw', w2_oi, y) + b2[None, :, None, None]
    return jnp.maximum(y + x, 0.0)


if __name__ == "__main__":
    # Small shapes consistent with ResBlock(input_channels=4, channel=8).
    B, Cin, Cmid, H, W = 2, 4, 8, 16, 16

    key = jax.random.PRNGKey(0)
    kx, k1, kb1, k2, kb2 = jax.random.split(key, 5)

    x = jax.random.normal(kx, (B, Cin, H, W), dtype=jnp.float32)
    # PyTorch-layout parameters: conv1 weight (Cmid, Cin, 3, 3), conv2 weight (Cin, Cmid).
    w1 = jax.random.normal(k1, (Cmid, Cin, 3, 3), dtype=jnp.float32) * 0.1
    b1 = jax.random.normal(kb1, (Cmid,), dtype=jnp.float32) * 0.1
    w2 = jax.random.normal(k2, (Cin, Cmid), dtype=jnp.float32) * 0.1
    b2 = jax.random.normal(kb2, (Cin,), dtype=jnp.float32) * 0.1

    fwd = jax.jit(resblock_forward)
    out = jax.block_until_ready(fwd(x, w1, b1, w2, b2))
    ref = jax.block_until_ready(resblock_reference(x, w1, b1, w2, b2))

    assert out.shape == (B, Cin, H, W)
    # Kernel runs fully in f32 (MXU f32 accumulation); tight tolerance vs the f32 ref.
    assert jnp.allclose(out, ref, atol=1e-2, rtol=1e-2), "mismatch vs reference"

    print("KERNEL_OK")
</pallas_src>

<mosaic_0001>
module attributes {stable_mosaic.version = 11 : i64} {
  func.func @_resblock_kernel(%arg0: i32, %arg1: memref<1x4x256xf32, #tpu.memory_space<vmem>>, %arg2: memref<9x8x4xf32, #tpu.memory_space<vmem>>, %arg3: memref<8x1xf32, #tpu.memory_space<vmem>>, %arg4: memref<4x8xf32, #tpu.memory_space<vmem>>, %arg5: memref<4x1xf32, #tpu.memory_space<vmem>>, %arg6: memref<1x4x256xf32, #tpu.memory_space<vmem>>) attributes {dimension_semantics = [#tpu.dimension_semantics<parallel>], iteration_bounds = array<i64: 2>, scalar_prefetch = 0 : i64, scratch_operands = 0 : i64, tpu.core_type = #tpu.core_type<tc>, window_params = [{transform_indices = @transform_0, window_bounds = array<i64: 1, 4, 256>}, {pipeline_mode = #tpu.pipeline_mode<synchronous>, transform_indices = @transform_1, window_bounds = array<i64: 9, 8, 4>}, {pipeline_mode = #tpu.pipeline_mode<synchronous>, transform_indices = @transform_2, window_bounds = array<i64: 8, 1>}, {pipeline_mode = #tpu.pipeline_mode<synchronous>, transform_indices = @transform_3, window_bounds = array<i64: 4, 8>}, {pipeline_mode = #tpu.pipeline_mode<synchronous>, transform_indices = @transform_4, window_bounds = array<i64: 4, 1>}, {transform_indices = @transform_5, window_bounds = array<i64: 1, 4, 256>}]} {
    %c0 = arith.constant 0 : index
    %c0_0 = arith.constant 0 : index
    %c0_1 = arith.constant 0 : index
    %0 = vector.load %arg2[%c0, %c0_0, %c0_1] : memref<9x8x4xf32, #tpu.memory_space<vmem>>, vector<1x8x4xf32>
    %1 = vector.shape_cast %0 : vector<1x8x4xf32> to vector<8x4xf32>
    %c1 = arith.constant 1 : index
    %c0_2 = arith.constant 0 : index
    %c0_3 = arith.constant 0 : index
    %2 = vector.load %arg2[%c1, %c0_2, %c0_3] : memref<9x8x4xf32, #tpu.memory_space<vmem>>, vector<1x8x4xf32>
    %3 = vector.shape_cast %2 : vector<1x8x4xf32> to vector<8x4xf32>
    %c2 = arith.constant 2 : index
    %c0_4 = arith.constant 0 : index
    %c0_5 = arith.constant 0 : index
    %4 = vector.load %arg2[%c2, %c0_4, %c0_5] : memref<9x8x4xf32, #tpu.memory_space<vmem>>, vector<1x8x4xf32>
    %5 = vector.shape_cast %4 : vector<1x8x4xf32> to vector<8x4xf32>
    %c3 = arith.constant 3 : index
    %c0_6 = arith.constant 0 : index
    %c0_7 = arith.constant 0 : index
    %6 = vector.load %arg2[%c3, %c0_6, %c0_7] : memref<9x8x4xf32, #tpu.memory_space<vmem>>, vector<1x8x4xf32>
    %7 = vector.shape_cast %6 : vector<1x8x4xf32> to vector<8x4xf32>
    %c4 = arith.constant 4 : index
    %c0_8 = arith.constant 0 : index
    %c0_9 = arith.constant 0 : index
    %8 = vector.load %arg2[%c4, %c0_8, %c0_9] : memref<9x8x4xf32, #tpu.memory_space<vmem>>, vector<1x8x4xf32>
    %9 = vector.shape_cast %8 : vector<1x8x4xf32> to vector<8x4xf32>
    %c5 = arith.constant 5 : index
    %c0_10 = arith.constant 0 : index
    %c0_11 = arith.constant 0 : index
    %10 = vector.load %arg2[%c5, %c0_10, %c0_11] : memref<9x8x4xf32, #tpu.memory_space<vmem>>, vector<1x8x4xf32>
    %11 = vector.shape_cast %10 : vector<1x8x4xf32> to vector<8x4xf32>
    %c6 = arith.constant 6 : index
    %c0_12 = arith.constant 0 : index
    %c0_13 = arith.constant 0 : index
    %12 = vector.load %arg2[%c6, %c0_12, %c0_13] : memref<9x8x4xf32, #tpu.memory_space<vmem>>, vector<1x8x4xf32>
    %13 = vector.shape_cast %12 : vector<1x8x4xf32> to vector<8x4xf32>
    %c7 = arith.constant 7 : index
    %c0_14 = arith.constant 0 : index
    %c0_15 = arith.constant 0 : index
    %14 = vector.load %arg2[%c7, %c0_14, %c0_15] : memref<9x8x4xf32, #tpu.memory_space<vmem>>, vector<1x8x4xf32>
    %15 = vector.shape_cast %14 : vector<1x8x4xf32> to vector<8x4xf32>
    %c8 = arith.constant 8 : index
    %c0_16 = arith.constant 0 : index
    %c0_17 = arith.constant 0 : index
    %16 = vector.load %arg2[%c8, %c0_16, %c0_17] : memref<9x8x4xf32, #tpu.memory_space<vmem>>, vector<1x8x4xf32>
    %17 = vector.shape_cast %16 : vector<1x8x4xf32> to vector<8x4xf32>
    %c0_18 = arith.constant 0 : index
    %c0_19 = arith.constant 0 : index
    %18 = vector.load %arg4[%c0_18, %c0_19] : memref<4x8xf32, #tpu.memory_space<vmem>>, vector<4x8xf32>
    %c0_20 = arith.constant 0 : index
    %c0_21 = arith.constant 0 : index
    %19 = vector.load %arg3[%c0_20, %c0_21] : memref<8x1xf32, #tpu.memory_space<vmem>>, vector<8x1xf32>
    %c0_22 = arith.constant 0 : index
    %c0_23 = arith.constant 0 : index
    %20 = vector.load %arg5[%c0_22, %c0_23] : memref<4x1xf32, #tpu.memory_space<vmem>>, vector<4x1xf32>
    %21 = tpu.iota {dimensions = array<i32: 1>} : vector<1x256xi32>
    %c16_i32 = arith.constant 16 : i32
    %c0_i32 = arith.constant 0 : i32
    %22 = arith.cmpi eq, %c16_i32, %c0_i32 : i32
    %c1_i32 = arith.constant 1 : i32
    %23 = arith.select %22, %c1_i32, %c16_i32 : i32
    %24 = vector.broadcast %23 : i32 to vector<1x256xi32>
    %25 = arith.remsi %21, %24 : vector<1x256xi32>
    %c0_i32_24 = arith.constant 0 : i32
    %26 = vector.broadcast %c0_i32_24 : i32 to vector<1x256xi32>
    %27 = arith.cmpi ne, %25, %26 : vector<1x256xi32>
    %c0_i32_25 = arith.constant 0 : i32
    %28 = vector.broadcast %c0_i32_25 : i32 to vector<1x256xi32>
    %29 = arith.cmpi slt, %25, %28 : vector<1x256xi32>
    %c0_i32_26 = arith.constant 0 : i32
    %30 = arith.cmpi slt, %23, %c0_i32_26 : i32
    %31 = vector.broadcast %30 : i1 to vector<1x256xi1>
    %32 = vector.broadcast %31 : vector<1x256xi1> to vector<1x256xi1>
    %33 = arith.xori %29, %32 : vector<1x256xi1>
    %34 = arith.andi %33, %27 : vector<1x256xi1>
    %35 = vector.broadcast %23 : i32 to vector<1x256xi32>
    %36 = arith.addi %25, %35 : vector<1x256xi32>
    %37 = arith.select %34, %36, %25 : vector<1x256xi1>, vector<1x256xi32>
    %c1_i32_27 = arith.constant 1 : i32
    %38 = vector.broadcast %c1_i32_27 : i32 to vector<1x256xi32>
    %39 = arith.cmpi sge, %37, %38 : vector<1x256xi32>
    %c14_i32 = arith.constant 14 : i32
    %40 = vector.broadcast %c14_i32 : i32 to vector<1x256xi32>
    %41 = arith.cmpi sle, %37, %40 : vector<1x256xi32>
    %cst = arith.constant 0.000000e+00 : f32
    %42 = vector.broadcast %cst : f32 to vector<4x128xf32>
    %c0_28 = arith.constant 0 : index
    %c0_29 = arith.constant 0 : index
    %c0_30 = arith.constant 0 : index
    %43 = vector.load %arg1[%c0_28, %c0_29, %c0_30] : memref<1x4x256xf32, #tpu.memory_space<vmem>>, vector<1x4x256xf32>
    %44 = vector.shape_cast %43 : vector<1x4x256xf32> to vector<4x256xf32>
    %45 = tpu.concatenate %42, %44, %42 in 1 : vector<4x128xf32>, vector<4x256xf32>, vector<4x128xf32> -> vector<4x512xf32>
    %46 = vector.extract_strided_slice %45 {offsets = [0, 111], sizes = [4, 256], strides = [1, 1]} : vector<4x512xf32> to vector<4x256xf32>
    %cst_31 = arith.constant 0.000000e+00 : f32
    %47 = vector.shape_cast %39 : vector<1x256xi1> to vector<1x256xi1>
    %48 = vector.broadcast %47 : vector<1x256xi1> to vector<4x256xi1>
    %49 = vector.broadcast %cst_31 : f32 to vector<4x256xf32>
    %50 = arith.select %48, %46, %49 : vector<4x256xi1>, vector<4x256xf32>
    %cst_32 = arith.constant dense<0.000000e+00> : vector<8x256xf32>
    %51 = tpu.matmul %1, %50, %cst_32 {dimension_numbers = #tpu.dot_dimension_numbers<[1], [0], [0], [1], [0, 0, 1, 1], [], []>} : vector<8x4xf32>, vector<4x256xf32>, vector<8x256xf32> -> vector<8x256xf32>
    %52 = vector.extract_strided_slice %45 {offsets = [0, 112], sizes = [4, 256], strides = [1, 1]} : vector<4x512xf32> to vector<4x256xf32>
    %cst_33 = arith.constant dense<0.000000e+00> : vector<8x256xf32>
    %53 = tpu.matmul %3, %52, %cst_33 {dimension_numbers = #tpu.dot_dimension_numbers<[1], [0], [0], [1], [0, 0, 1, 1], [], []>} : vector<8x4xf32>, vector<4x256xf32>, vector<8x256xf32> -> vector<8x256xf32>
    %54 = arith.addf %51, %53 : vector<8x256xf32>
    %55 = vector.extract_strided_slice %45 {offsets = [0, 113], sizes = [4, 256], strides = [1, 1]} : vector<4x512xf32> to vector<4x256xf32>
    %cst_34 = arith.constant 0.000000e+00 : f32
    %56 = vector.shape_cast %41 : vector<1x256xi1> to vector<1x256xi1>
    %57 = vector.broadcast %56 : vector<1x256xi1> to vector<4x256xi1>
    %58 = vector.broadcast %cst_34 : f32 to vector<4x256xf32>
    %59 = arith.select %57, %55, %58 : vector<4x256xi1>, vector<4x256xf32>
    %cst_35 = arith.constant dense<0.000000e+00> : vector<8x256xf32>
    %60 = tpu.matmul %5, %59, %cst_35 {dimension_numbers = #tpu.dot_dimension_numbers<[1], [0], [0], [1], [0, 0, 1, 1], [], []>} : vector<8x4xf32>, vector<4x256xf32>, vector<8x256xf32> -> vector<8x256xf32>
    %61 = arith.addf %54, %60 : vector<8x256xf32>
    %62 = vector.extract_strided_slice %45 {offsets = [0, 127], sizes = [4, 256], strides = [1, 1]} : vector<4x512xf32> to vector<4x256xf32>
    %cst_36 = arith.constant 0.000000e+00 : f32
    %63 = vector.shape_cast %39 : vector<1x256xi1> to vector<1x256xi1>
    %64 = vector.broadcast %63 : vector<1x256xi1> to vector<4x256xi1>
    %65 = vector.broadcast %cst_36 : f32 to vector<4x256xf32>
    %66 = arith.select %64, %62, %65 : vector<4x256xi1>, vector<4x256xf32>
    %cst_37 = arith.constant dense<0.000000e+00> : vector<8x256xf32>
    %67 = tpu.matmul %7, %66, %cst_37 {dimension_numbers = #tpu.dot_dimension_numbers<[1], [0], [0], [1], [0, 0, 1, 1], [], []>} : vector<8x4xf32>, vector<4x256xf32>, vector<8x256xf32> -> vector<8x256xf32>
    %68 = arith.addf %61, %67 : vector<8x256xf32>
    %69 = vector.extract_strided_slice %45 {offsets = [0, 128], sizes = [4, 256], strides = [1, 1]} : vector<4x512xf32> to vector<4x256xf32>
    %cst_38 = arith.constant dense<0.000000e+00> : vector<8x256xf32>
    %70 = tpu.matmul %9, %69, %cst_38 {dimension_numbers = #tpu.dot_dimension_numbers<[1], [0], [0], [1], [0, 0, 1, 1], [], []>} : vector<8x4xf32>, vector<4x256xf32>, vector<8x256xf32> -> vector<8x256xf32>
    %71 = arith.addf %68, %70 : vector<8x256xf32>
    %72 = vector.extract_strided_slice %45 {offsets = [0, 129], sizes = [4, 256], strides = [1, 1]} : vector<4x512xf32> to vector<4x256xf32>
    %cst_39 = arith.constant 0.000000e+00 : f32
    %73 = vector.shape_cast %41 : vector<1x256xi1> to vector<1x256xi1>
    %74 = vector.broadcast %73 : vector<1x256xi1> to vector<4x256xi1>
    %75 = vector.broadcast %cst_39 : f32 to vector<4x256xf32>
    %76 = arith.select %74, %72, %75 : vector<4x256xi1>, vector<4x256xf32>
    %cst_40 = arith.constant dense<0.000000e+00> : vector<8x256xf32>
    %77 = tpu.matmul %11, %76, %cst_40 {dimension_numbers = #tpu.dot_dimension_numbers<[1], [0], [0], [1], [0, 0, 1, 1], [], []>} : vector<8x4xf32>, vector<4x256xf32>, vector<8x256xf32> -> vector<8x256xf32>
    %78 = arith.addf %71, %77 : vector<8x256xf32>
    %79 = vector.extract_strided_slice %45 {offsets = [0, 143], sizes = [4, 256], strides = [1, 1]} : vector<4x512xf32> to vector<4x256xf32>
    %cst_41 = arith.constant 0.000000e+00 : f32
    %80 = vector.shape_cast %39 : vector<1x256xi1> to vector<1x256xi1>
    %81 = vector.broadcast %80 : vector<1x256xi1> to vector<4x256xi1>
    %82 = vector.broadcast %cst_41 : f32 to vector<4x256xf32>
    %83 = arith.select %81, %79, %82 : vector<4x256xi1>, vector<4x256xf32>
    %cst_42 = arith.constant dense<0.000000e+00> : vector<8x256xf32>
    %84 = tpu.matmul %13, %83, %cst_42 {dimension_numbers = #tpu.dot_dimension_numbers<[1], [0], [0], [1], [0, 0, 1, 1], [], []>} : vector<8x4xf32>, vector<4x256xf32>, vector<8x256xf32> -> vector<8x256xf32>
    %85 = arith.addf %78, %84 : vector<8x256xf32>
    %86 = vector.extract_strided_slice %45 {offsets = [0, 144], sizes = [4, 256], strides = [1, 1]} : vector<4x512xf32> to vector<4x256xf32>
    %cst_43 = arith.constant dense<0.000000e+00> : vector<8x256xf32>
    %87 = tpu.matmul %15, %86, %cst_43 {dimension_numbers = #tpu.dot_dimension_numbers<[1], [0], [0], [1], [0, 0, 1, 1], [], []>} : vector<8x4xf32>, vector<4x256xf32>, vector<8x256xf32> -> vector<8x256xf32>
    %88 = arith.addf %85, %87 : vector<8x256xf32>
    %89 = vector.extract_strided_slice %45 {offsets = [0, 145], sizes = [4, 256], strides = [1, 1]} : vector<4x512xf32> to vector<4x256xf32>
    %cst_44 = arith.constant 0.000000e+00 : f32
    %90 = vector.shape_cast %41 : vector<1x256xi1> to vector<1x256xi1>
    %91 = vector.broadcast %90 : vector<1x256xi1> to vector<4x256xi1>
    %92 = vector.broadcast %cst_44 : f32 to vector<4x256xf32>
    %93 = arith.select %91, %89, %92 : vector<4x256xi1>, vector<4x256xf32>
    %cst_45 = arith.constant dense<0.000000e+00> : vector<8x256xf32>
    %94 = tpu.matmul %17, %93, %cst_45 {dimension_numbers = #tpu.dot_dimension_numbers<[1], [0], [0], [1], [0, 0, 1, 1], [], []>} : vector<8x4xf32>, vector<4x256xf32>, vector<8x256xf32> -> vector<8x256xf32>
    %95 = arith.addf %88, %94 : vector<8x256xf32>
    %96 = vector.broadcast %19 : vector<8x1xf32> to vector<8x256xf32>
    %97 = arith.addf %95, %96 : vector<8x256xf32>
    %cst_46 = arith.constant 0.000000e+00 : f32
    %98 = vector.broadcast %cst_46 : f32 to vector<8x256xf32>
    %99 = arith.maximumf %97, %98 : vector<8x256xf32>
    %cst_47 = arith.constant dense<0.000000e+00> : vector<4x256xf32>
    %100 = tpu.matmul %18, %99, %cst_47 {dimension_numbers = #tpu.dot_dimension_numbers<[1], [0], [0], [1], [0, 0, 1, 1], [], []>} : vector<4x8xf32>, vector<8x256xf32>, vector<4x256xf32> -> vector<4x256xf32>
    %101 = vector.broadcast %20 : vector<4x1xf32> to vector<4x256xf32>
    %102 = arith.addf %100, %101 : vector<4x256xf32>
    %103 = arith.addf %102, %44 : vector<4x256xf32>
    %cst_48 = arith.constant 0.000000e+00 : f32
    %104 = vector.broadcast %cst_48 : f32 to vector<4x256xf32>
    %105 = arith.maximumf %103, %104 : vector<4x256xf32>
    %c0_49 = arith.constant 0 : index
    %c0_50 = arith.constant 0 : index
    %c0_51 = arith.constant 0 : index
    %106 = vector.load %arg6[%c0_49, %c0_50, %c0_51] : memref<1x4x256xf32, #tpu.memory_space<vmem>>, vector<1x4x256xf32>
    %107 = vector.shape_cast %106 : vector<1x4x256xf32> to vector<4x256xf32>
    %108 = vector.shape_cast %105 : vector<4x256xf32> to vector<1x4x256xf32>
    tpu.vector_store %arg6[%c0_49, %c0_50, %c0_51], %108 {strides = array<i32>} : memref<1x4x256xf32, #tpu.memory_space<vmem>>, vector<1x4x256xf32>,
    return
  }
  func.func @transform_0(%arg0: i32) -> (i32, i32, i32) {
    %c0_i32 = arith.constant 0 : i32
    %c0_i32_0 = arith.constant 0 : i32
    %c0_i32_1 = arith.constant 0 : i32
    return %arg0, %c0_i32, %c0_i32_0 : i32, i32, i32
  }
  func.func @transform_1(%arg0: i32) -> (i32, i32, i32) {
    %c0_i32 = arith.constant 0 : i32
    %c0_i32_0 = arith.constant 0 : i32
    %c0_i32_1 = arith.constant 0 : i32
    %c0_i32_2 = arith.constant 0 : i32
    return %c0_i32, %c0_i32_0, %c0_i32_1 : i32, i32, i32
  }
  func.func @transform_2(%arg0: i32) -> (i32, i32) {
    %c0_i32 = arith.constant 0 : i32
    %c0_i32_0 = arith.constant 0 : i32
    %c0_i32_1 = arith.constant 0 : i32
    return %c0_i32, %c0_i32_0 : i32, i32
  }
  func.func @transform_3(%arg0: i32) -> (i32, i32) {
    %c0_i32 = arith.constant 0 : i32
    %c0_i32_0 = arith.constant 0 : i32
    %c0_i32_1 = arith.constant 0 : i32
    return %c0_i32, %c0_i32_0 : i32, i32
  }
  func.func @transform_4(%arg0: i32) -> (i32, i32) {
    %c0_i32 = arith.constant 0 : i32
    %c0_i32_0 = arith.constant 0 : i32
    %c0_i32_1 = arith.constant 0 : i32
    return %c0_i32, %c0_i32_0 : i32, i32
  }
  func.func @transform_5(%arg0: i32) -> (i32, i32, i32) {
    %c0_i32 = arith.constant 0 : i32
    %c0_i32_0 = arith.constant 0 : i32
    %c0_i32_1 = arith.constant 0 : i32
    return %arg0, %c0_i32, %c0_i32_0 : i32, i32, i32
  }
}

</mosaic_0001>

<bundles_post_ra>
// kernel: resblock_forward.1
= control target key start
LH: loop header
LB: loop body
LE: loop exit
PB: predicated region body
PF: predicated region fallthrough
CT: control target
= control target key end

     0   :  { %s1092_s18 = smov 0   ;;  %s1259_s0 = inlined_call_operand.vmem [shape: f32[2,4,256], index: 0, kind: input, shape index: {}]   ;;  %s1260_s1 = inlined_call_operand.vmem [shape: f32[9,8,4], index: 1, kind: input, shape index: {}]   ;;  %s1261_s2 = inlined_call_operand.vmem [shape: f32[8,1], index: 2, kind: input, shape index: {}]   ;;  %s1262_s3 = inlined_call_operand.vmem [shape: f32[4,8], index: 3, kind: input, shape index: {}]   ;;  %s1263_s4 = inlined_call_operand.vmem [shape: f32[4,1], index: 4, kind: input, shape index: {}]   ;;  %s1264_s5 = inlined_call_operand.vmem [shape: f32[2,4,256], index: 5, kind: output, shape index: {}]  }
   0x1 LB: > { %s965_s19 = sadd.s32 4294967295, %s1050_s18   ;;  %p969_p0 = scmp.ge.s32.totalorder %s1050_s18, 1  ;;  %s1050_s18 = sphi %s1092_s18, %s15_s18  }
   0x2   : > { %p187_p1 = scmp.lt.s32.totalorder %s1050_s18, 3 }
   0x4   : > { %p188_p2 = pnand %p969_p0, %p187_p1 }
   0x5   : > { %p215_p3 = scmp.lt.s32.totalorder (!%p188_p2), %s965_s19, 1  ;;  %s1053_s20 = smov (!%p188_p2), 17  }
   0x6   : > { %191 = sbr.rel (%p188_p2) target bundleno = 472 (0x1d8), region = 40  ;;  %s1054_s25 = smov (!%p188_p2), 16  }
   0x7   : > { %s1055_s26 = smov (!%p188_p2), 1   ;;  %s1056_s27 = smov (!%p188_p2), 15  }
   0x8   : > { %s1057_s28 = smov (!%p188_p2), 127   ;;  %s1058_s29 = smov (!%p188_p2), 112  }
   0x9   : > { %s1059_s30 = smov (!%p188_p2), 113   ;;  %s1060_s6 = smov (!%p188_p2), 111  }
   0xb   : > { %s1274_s19 = smov (!%p215_p3, %s965_s19), 1  ;;  %v1052_v0 = vmov 0.0   ;;  %v245_v7 = vlaneseq  ;;  %vm480_vm0 = vcmask 7168   ;;  %vm305_vm1 = vcmask 130048   ;;  %v974_v16 = vld [vmem:[%s1260_s1 + $0x8] sm:$0xff]  ;;  %v225_v19 = vld [vmem:[%s1260_s1] sm:$0xff] }
   0xc   : > { %286 = vrot.lane.b32.xlu2 %v1052_v0, %s1053_s20  ;;  %s1022_s21 = sshll.u32 %s1274_s19, 3  ;;  %vm292_vm2 = vcmask 138240   ;;  %vm312_vm3 = vcmask 1043456   ;;  %vm308_vm5 = vcmask 31744   ;;  %v976_v28 = vld [vmem:[%s1260_s1 + $0x18] sm:$0xff]  ;;  %vm416_vm7 = vcmask 121856  }
   0xd   : > { %s219_s24 = scalar_lea.vmem %s1259_s0, %s1022_s21  ;;  %v246_v8 = vand.u32 127, %v245_v7  ;;  %v975_v35 = vld [vmem:[%s1260_s1 + $0x10] sm:$0xff]  ;;  %v977_v45 = vld [vmem:[%s1260_s1 + $0x20] sm:$0xff]  ;;  %vm593_vm10 = vcmask 1039360   ;;  %v1061_v47 = vmov 0   ;;  %vm721_vm11 = vcmask 916480   ;;  %s224_s11 = scalar_lea.vmem %s1264_s5, %s1022_s21 }
   0xe   : > { %v276_v1 = vld [vmem:[%s219_s24] sm:$0xff]  ;;  %1042 = vset.pattern.permute.xlu0 %v1061_v47  ;;  %1043 = vset.pattern.permute.xlu1 %v1061_v47  ;;  %v978_v53 = vld [vmem:[%s1260_s1 + $0x28] sm:$0xff]  ;;  %vm657_vm12 = vcmask 924672   ;;  %v979_v60 = vld [vmem:[%s1260_s1 + $0x30] sm:$0xff]  ;;  %vm779_vm13 = vcmask 908288   ;;  %vm851_vm14 = vcmask 64512  }
   0xf   : > { %278 = vst [vmem:[#allocation1] ss:$2 sm:$0xff] %v276_v1  ;;  %v252_v9 = vand.u32 15, %v246_v8  ;;  %v247_v12 = vadd.s32 128, %v246_v8  ;;  %v243_v46 = vld [vmem:[%s1261_s2] sm:$0xff]  ;;  %v980_v61 = vld [vmem:[%s1260_s1 + $0x38] sm:$0xff] }
  0x11   : > { %vm1128_vm4 = vcmp.ge.s32.totalorder %v252_v9, 1  ;;  %v259_v22 = vand.u32 15, %v247_v12  ;;  %vm1179_vm9 = vcmp.le.s32.totalorder %v252_v9, 14  ;;  %v981_v9 = vld [vmem:[%s1260_s1 + $0x40] sm:$0xff] }
  0x13   : > { %vm1150_vm6 = vcmp.ge.s32.totalorder %v259_v22, 1  ;;  %vm1166_vm8 = vcmp.le.s32.totalorder %v259_v22, 14 }
  0x14   : > { %299 = vrot.lane.b32.xlu2 %v1052_v0, %s1054_s25 }
  0x16   : > { %v1108_v2 = vld.sshfl [vmem:[#allocation1] sm:$0xff pattern:$0x75316420]  ;;  %v1110_v3 = vld.sshfl [vmem:[#allocation1 + $0x8] sm:$0xff pattern:$0x75316420] }
  0x17   : > { %301 = vrot.lane.b32.xlu1 %v1108_v2, %s1054_s25  ;;  %288 = vrot.lane.b32.xlu0 %v1108_v2, %s1053_s20  ;;  %895 = vst [vmem:[#allocation1] ss:$2 sm:$0xff] %v276_v1 }
  0x1c   : > { %476 = vrot.lane.b32.xlu2 %v1108_v2, %s1055_s26 }
  0x1f   : > { %303 = vrot.lane.b32.xlu1 %v1110_v3, %s1054_s25  ;;  %290 = vrot.lane.b32.xlu0 %v1110_v3, %s1053_s20 }
  0x24   : > { %474 = vrot.lane.b32.xlu2 %v1052_v0, %s1055_s26 }
  0x27   : > { %414 = vrot.lane.b32.xlu1 %v1110_v3, %s1056_s27  ;;  %412 = vrot.lane.b32.xlu0 %v1108_v2, %s1056_s27 }
  0x2c   : > { %587 = vrot.lane.b32.xlu2 %v1108_v2, %s1057_s28 }
  0x2f   : > { %410 = vrot.lane.b32.xlu1 %v1052_v0, %s1056_s27  ;;  %478 = vrot.lane.b32.xlu0 %v1110_v3, %s1055_s26 }
  0x34   : > { %717 = vrot.lane.b32.xlu2 %v1110_v3, %s1058_s29 }
  0x37   : > { %591 = vrot.lane.b32.xlu1 %v1052_v0, %s1057_s28  ;;  %589 = vrot.lane.b32.xlu0 %v1110_v3, %s1057_s28 }
  0x3c   : > { %715 = vrot.lane.b32.xlu2 %v1108_v2, %s1058_s29 }
  0x3f   : > { %655 = vrot.lane.b32.xlu1 %v1052_v0, %s1059_s30  ;;  %653 = vrot.lane.b32.xlu0 %v1110_v3, %s1059_s30 }
  0x44   : > { %773 = vrot.lane.b32.xlu2 %v1108_v2, %s1060_s6 }
  0x47   : > { %651 = vrot.lane.b32.xlu1 %v1108_v2, %s1059_s30  ;;  %719 = vrot.lane.b32.xlu0 %v1052_v0, %s1058_s29 }
  0x4f   : > { %777 = vrot.lane.b32.xlu1 %v1052_v0, %s1060_s6  ;;  %775 = vrot.lane.b32.xlu0 %v1110_v3, %s1060_s6 }
  0x57   : > { %839 = vperm.xlu0 %1042, %v243_v46  }
  0x66   : > { %v287_v4 = vpop.permute.xlu2 %286 }
  0x6e   : > { %v300_v5 = vpop.permute.xlu2 %299 }
  0x76   : > { %v477_v6 = vpop.permute.xlu2 %476 }
  0x7e   : > { %v475_v10 = vpop.permute.xlu2 %474 }
  0x7f   : > { %v481_v13 = vsel %vm480_vm0, %v475_v10, %v477_v6 }
  0x80   : > { %v485_v21 = vsel %vm1128_vm4, %v481_v13, 0.0 }
  0x86   : > { %v588_v30 = vpop.permute.xlu2 %587 }
  0x89   : > { %v302_v14 = vpop.permute.xlu1 %301  ;;  %v289_v15 = vpop.permute.xlu0 %288 }
  0x8a   : > { %v306_v17 = vsel %vm305_vm1, %v300_v5, %v302_v14  ;;  %v293_v18 = vsel %vm292_vm2, %v287_v4, %v289_v15 }
  0x8b   : > { %982 = vmatpush.msk.msra.mxu0 %vm312_vm3, %v306_v17  ;;  %v297_v20 = vsel %vm1128_vm4, %v293_v18, 0.0  ;;  %v244_v18 = vld [vmem:[%s1263_s4] sm:$0xf] }
  0x8c   : > { %986 = vmatpush.msk.msra.mxu2 %vm312_vm3, %v297_v20  ;;  %983 = vmatmul.msk.f32.vlgmr.msra.gmra.mxu0 %vm308_vm5, %v974_v16 }
  0x8d   : > { %987 = vmatmul.msk.f32.vlgmr.msra.gmra.mxu2 %vm308_vm5, %v225_v19  ;;  %848 = vperm.xlu1 %1043, %v244_v18  }
  0x8e   : > { %994 = vmatpush.msk.msrb.mxu2 %vm312_vm3, %v485_v21  ;;  %v718_v37 = vpop.permute.xlu2 %717 }
  0x91   : > { %v304_v24 = vpop.permute.xlu1 %303  ;;  %v291_v25 = vpop.permute.xlu0 %290 }
  0x92   : > { %v307_v26 = vsel %vm305_vm1, %v302_v14, %v304_v24  ;;  %v294_v27 = vsel %vm292_vm2, %v289_v15, %v291_v25 }
  0x93   : > { %984 = vmatpush.msk.msra.mxu1 %vm312_vm3, %v307_v26  ;;  %v298_v29 = vsel %vm1150_vm6, %v294_v27, 0.0 }
  0x94   : > { %988 = vmatpush.msk.msra.mxu3 %vm312_vm3, %v298_v29  ;;  %985 = vmatmul.msk.f32.vlgmr.msra.gmra.mxu1 %vm308_vm5, %v974_v16 }
  0x95   : > { %989 = vmatmul.msk.f32.vlgmr.msra.gmra.mxu3 %vm308_vm5, %v225_v19  ;;  %995 = vmatmul.msk.f32.vlgmr.msrb.gmra.mxu2 %vm308_vm5, %v976_v28 }
  0x96   : > { %v716_v48 = vpop.permute.xlu2 %715 }
  0x97   : > { %v722_v56 = vsel %vm721_vm11, %v716_v48, %v718_v37 }
  0x99   : > { %v415_v32 = vpop.permute.xlu1 %414  ;;  %v413_v33 = vpop.permute.xlu0 %412 }
  0x9a   : > { %v418_v34 = vsel %vm416_vm7, %v413_v33, %v415_v32 }
  0x9b   : > { %v422_v36 = vsel %vm1166_vm8, %v418_v34, 0.0 }
  0x9c   : > { %992 = vmatpush.msk.msrb.mxu1 %vm312_vm3, %v422_v36 }
  0x9d   : > { %993 = vmatmul.msk.f32.vlgmr.msrb.gmra.mxu1 %vm308_vm5, %v975_v35 }
  0x9e   : > { %1000 = vmatpush.msk.msra.mxu1 %vm312_vm3, %v1110_v3  ;;  %v774_v4 = vpop.permute.xlu2 %773 }
  0xa1   : > { %v411_v39 = vpop.permute.xlu1 %410  ;;  %v479_v40 = vpop.permute.xlu0 %478 }
  0xa2   : > { %v417_v41 = vsel %vm416_vm7, %v411_v39, %v413_v33  ;;  %v482_v42 = vsel %vm480_vm0, %v477_v6, %v479_v40 }
  0xa3   : > { %v421_v43 = vsel %vm1179_vm9, %v417_v41, 0.0  ;;  %v486_v44 = vsel %vm1150_vm6, %v482_v42, 0.0 }
  0xa4   : > { %990 = vmatpush.msk.msrb.mxu0 %vm312_vm3, %v421_v43  ;;  %996 = vmatpush.msk.msrb.mxu3 %vm312_vm3, %v486_v44 }
  0xa5   : > { %991 = vmatmul.msk.f32.vlgmr.msrb.gmra.mxu0 %vm308_vm5, %v975_v35  ;;  %997 = vmatmul.msk.f32.vlgmr.msrb.gmra.mxu3 %vm308_vm5, %v976_v28 }
  0xa6   : > { %998 = vmatpush.msk.msra.mxu0 %vm312_vm3, %v1108_v2  ;;  %1001 = vmatmul.msk.f32.vlgmr.msra.gmra.mxu1 %vm308_vm5, %v977_v45 }
  0xa9   : > { %v592_v49 = vpop.permute.xlu1 %591  ;;  %v590_v50 = vpop.permute.xlu0 %589 }
  0xaa   : > { %v594_v51 = vsel %vm593_vm10, %v588_v30, %v590_v50  ;;  %v595_v52 = vsel %vm593_vm10, %v590_v50, %v592_v49 }
  0xab   : > { %v598_v54 = vsel %vm1179_vm9, %v594_v51, 0.0  ;;  %v599_v55 = vsel %vm1166_vm8, %v595_v52, 0.0  ;;  %v242_v52 = vld [vmem:[%s1262_s3] sm:$0xf] }
  0xac   : > { %1002 = vmatpush.msk.msra.mxu2 %vm312_vm3, %v598_v54  ;;  %1004 = vmatpush.msk.msra.mxu3 %vm312_vm3, %v599_v55  ;;  %v897_v55 = vld.sshfl [vmem:[#allocation1 + $0x8] sm:$0xff pattern:$0x75316420] }
  0xad   : > { %999 = vmatmul.msk.f32.vlgmr.msra.gmra.mxu0 %vm308_vm5, %v977_v45  ;;  %1003 = vmatmul.msk.f32.vlgmr.msra.gmra.mxu2 %vm308_vm5, %v978_v53 }
  0xae   : > { %1005 = vmatmul.msk.f32.vlgmr.msra.gmra.mxu3 %vm308_vm5, %v978_v53  ;;  %1010 = vmatpush.msk.msrb.mxu2 %vm312_vm3, %v722_v56 }
  0xb1   : > { %v656_v57 = vpop.permute.xlu1 %655  ;;  %v654_v58 = vpop.permute.xlu0 %653 }
  0xb2   : > { %v659_v59 = vsel %vm657_vm12, %v654_v58, %v656_v57  ;;  %v896_v57 = vld.sshfl [vmem:[#allocation1] sm:$0xff pattern:$0x75316420] }
  0xb3   : > { %v663_v62 = vsel %vm1150_vm6, %v659_v59, 0.0 }
  0xb4   : > { %1008 = vmatpush.msk.msrb.mxu1 %vm312_vm3, %v663_v62 }
  0xb5   : > { %1009 = vmatmul.msk.f32.vlgmr.msrb.gmra.mxu1 %vm308_vm5, %v979_v60  ;;  %1011 = vmatmul.msk.f32.vlgmr.msrb.gmra.mxu2 %vm308_vm5, %v980_v61 }
  0xb9   : > { %v652_v63 = vpop.permute.xlu1 %651  ;;  %v720_v0 = vpop.permute.xlu0 %719 }
  0xba   : > { %v658_v1 = vsel %vm657_vm12, %v652_v63, %v654_v58  ;;  %v723_v2 = vsel %vm721_vm11, %v718_v37, %v720_v0 }
  0xbb   : > { %v662_v3 = vsel %vm1128_vm4, %v658_v1, 0.0  ;;  %1012 = vmatpush.msk.msrb.mxu3 %vm312_vm3, %v723_v2 }
  0xbc   : > { %1006 = vmatpush.msk.msrb.mxu0 %vm312_vm3, %v662_v3  ;;  %1013 = vmatmul.msk.f32.vlgmr.msrb.gmra.mxu3 %vm308_vm5, %v980_v61 }
  0xbd   : > { %1007 = vmatmul.msk.f32.vlgmr.msrb.gmra.mxu0 %vm308_vm5, %v979_v60 }
  0xc1   : > { %v778_v5 = vpop.permute.xlu1 %777  ;;  %v776_v6 = vpop.permute.xlu0 %775 }
  0xc2   : > { %v780_v7 = vsel %vm779_vm13, %v774_v4, %v776_v6  ;;  %v781_v8 = vsel %vm779_vm13, %v776_v6, %v778_v5 }
  0xc3   : > { %v784_v10 = vsel %vm1179_vm9, %v780_v7, 0.0  ;;  %v785_v11 = vsel %vm1166_vm8, %v781_v8, 0.0 }
  0xc4   : > { %1014 = vmatpush.msk.msra.mxu0 %vm312_vm3, %v784_v10  ;;  %1016 = vmatpush.msk.msra.mxu1 %vm312_vm3, %v785_v11 }
  0xc5   : > { %1015 = vmatmul.msk.f32.vlgmr.msra.gmra.mxu0 %vm308_vm5, %v981_v9  ;;  %1017 = vmatmul.msk.f32.vlgmr.msra.gmra.mxu1 %vm308_vm5, %v981_v9 }
  0xc9   : > { %v840_v43 = vpop.permute.xlu0 %839 }
  0xff   : > { %v849_v53 = vpop.permute.xlu1 %848 }
 0x109   : > { %v334_v13 = vpop.f32.mrf.mxu0 }
 0x110   : > { %v383_v14 = vpop.f32.mrf.mxu2 }
 0x111   : > { %v354_v12 = vpop.f32.mrf.mxu1  ;;  %v384_v20 = vadd.f32 %v383_v14, %v334_v13 }
 0x118   : > { %v403_v15 = vpop.f32.mrf.mxu3  ;;  %v513_v19 = vpop.f32.mrf.mxu2 }
 0x119   : > { %v404_v22 = vadd.f32 %v403_v15, %v354_v12 }
 0x11a   : > { %v469_v16 = vpop.f32.mrf.mxu1 }
 0x11b   : > { %v473_v25 = vadd.f32 %v469_v16, %v404_v22 }
 0x122   : > { %v449_v17 = vpop.f32.mrf.mxu0 }
 0x123   : > { %v582_v23 = vpop.f32.mrf.mxu1  ;;  %v472_v24 = vadd.f32 %v449_v17, %v384_v20 }
 0x125   : > { %v536_v28 = vadd.f32 %v513_v19, %v472_v24 }
 0x128   : > { %v533_v21 = vpop.f32.mrf.mxu3 }
 0x129   : > { %v537_v27 = vadd.f32 %v533_v21, %v473_v25 }
 0x12a   : > { %v562_v26 = vpop.f32.mrf.mxu0 }
 0x12b   : > { %v586_v31 = vadd.f32 %v582_v23, %v537_v27  ;;  %v585_v32 = vadd.f32 %v562_v26, %v536_v28 }
 0x130   : > { %v626_v29 = vpop.f32.mrf.mxu2 }
 0x131   : > { %v646_v30 = vpop.f32.mrf.mxu3  ;;  %v649_v36 = vadd.f32 %v626_v29, %v585_v32 }
 0x132   : > { %v650_v33 = vadd.f32 %v646_v30, %v586_v31  ;;  %v710_v34 = vpop.f32.mrf.mxu1 }
 0x134   : > { %v714_v38 = vadd.f32 %v710_v34, %v650_v33 }
 0x138   : > { %v748_v39 = vpop.f32.mrf.mxu2 }
 0x13a   : > { %v690_v35 = vpop.f32.mrf.mxu0 }
 0x13b   : > { %v713_v37 = vadd.f32 %v690_v35, %v649_v36 }
 0x13d   : > { %v771_v42 = vadd.f32 %v748_v39, %v713_v37 }
 0x13f   : > { %v768_v40 = vpop.f32.mrf.mxu3 }
 0x140   : > { %v772_v41 = vadd.f32 %v768_v40, %v714_v38 }
 0x142   : > { %v812_v44 = vpop.f32.mrf.mxu0  ;;  %v832_v45 = vpop.f32.mrf.mxu1 }
 0x143   : > { %v835_v46 = vadd.f32 %v812_v44, %v771_v42  ;;  %v836_v47 = vadd.f32 %v832_v45, %v772_v41 }
 0x145   : > { %v842_v48 = vadd.f32 %v840_v43, %v835_v46  ;;  %v843_v49 = vadd.f32 %v840_v43, %v836_v47 }
 0x147   : > { %v844_v50 = vmax.f32 %v842_v48, 0.0  ;;  %v845_v51 = vmax.f32 %v843_v49, 0.0 }
 0x149   : > { %870 = vmatpush.msra.mxu2 %v844_v50  ;;  %890 = vmatpush.msra.mxu3 %v845_v51 }
 0x14a   : > { %1019 = vmatmul.msk.f32.vlgmr.msra.gmra.mxu3 %vm851_vm14, %v242_v52  ;;  %1018 = vmatmul.msk.f32.vlgmr.msra.gmra.mxu2 %vm851_vm14, %v242_v52 }
 0x1cd   : > { %v892_v54 = vpop.f32.mrf.mxu3  ;;  %v872_v56 = vpop.f32.mrf.mxu2 }
 0x1ce   : > { %v893_v58 = vadd.f32 %v892_v54, %v849_v53  ;;  %v873_v59 = vadd.f32 %v872_v56, %v849_v53 }
 0x1d0   : > { %v901_v60 = vadd.f32 %v897_v55, %v893_v58  ;;  %v900_v61 = vadd.f32 %v896_v57, %v873_v59 }
 0x1d2   : > { %v903_v62 = vmax.f32 %v901_v60, 0.0  ;;  %v902_v0 = vmax.f32 %v900_v61, 0.0 }
 0x1d4   : > { %v906_v63 = vrot.slane %v903_v62, 4 }
 0x1d6   : > { %v907_v1 = vsel %vm312_vm3, %v902_v0, %v906_v63 }
 0x1d7   : > { %909 = vst [vmem:[%s224_s11] sm:$0xff] %v907_v1 }
 0x1d8 PF: > { %s15_s18 = sadd.s32 1, %s1050_s18  }
 0x1d9   : > { %p12_p4 = scmp.ge.s32.totalorder %s15_s18, 4  }
 0x1db   :  { %14 = sbr.rel (!%p12_p4) target bundleno = 1 (0x1), region = 78 }

</bundles_post_ra>
